<compile_context>
chip_gen: v7x
topology: tpu7x:2x2x1
jax: 0.10.0
libtpu: 0.0.40
codegen_flags: <defaults>
</compile_context>

<pallas_src>
import jax
import jax.numpy as jnp
import numpy as np
from jax.experimental import pallas as pl
from jax.experimental.pallas import tpu as pltpu


def _round_up(x, m):
    return ((x + m - 1) // m) * m


def _vmem_need_bytes(bb, S_pad, E, D, d_chunk, enc_itemsize, we_itemsize):
    """Conservative per-step VMEM working set for a batch block of size bb."""
    rows = bb * S_pad
    return int(
        2 * rows * E * enc_itemsize              # double-buffered encoder stream
        + 2 * rows * 4                           # double-buffered (bb, S_pad) f32 out
        + 2 * bb * D * 4                         # hb block (f32)
        + 2 * (E * D * we_itemsize + 2 * D * 4)  # W_e + v (counted x2 to be safe)
        + 3 * rows * min(d_chunk, D) * 4         # live f32 proj / energy / product
    )


def _choose_bb(B, S_pad, E, D, d_chunk, enc_itemsize, we_itemsize, budget,
               row_target=512):
    """Batch-block size: a multiple of 8 (sublane rule) unless bb == B <= 8."""
    if B <= 8:
        return B
    B8 = _round_up(B, 8)
    cands = list(range(8, B8 + 1, 8))
    fitting = [c for c in cands
               if _vmem_need_bytes(c, S_pad, E, D, d_chunk,
                                   enc_itemsize, we_itemsize) <= budget]
    if not fitting:
        fitting = [8]

    def steps(bb):
        return -(-B // bb)   # ceil div

    # Prefer the smallest block that (a) reaches the MXU-row / per-step-overhead
    # target and (b) keeps >= 2 grid steps (both v7x TensorCores busy).
    good = [c for c in fitting if c * S_pad >= row_target and steps(c) >= 2]
    if good:
        return min(good)
    good = [c for c in fitting if c * S_pad >= row_target]
    if good:
        return min(good)
    return max(fitting)


def _make_attention_kernel(bb, S_pad, S, d_chunk, n_chunks):
    def kernel(hb_ref, enc_ref, we_ref, v_ref, out_ref):
        # hb_ref : (bb, D)        f32   precomputed hidden[-1] @ W_h + b
        # enc_ref: (bb*S_pad, E)  compute dtype, flattened encoder rows
        # we_ref : (E, D)         compute dtype
        # v_ref  : (1, D)         f32
        # out_ref: (bb, S_pad)    f32, src_len on the lane axis
        enc = enc_ref[...]                                    # (rows, E)
        score = jnp.zeros((bb, S_pad), jnp.float32)

        # score[b, s] = sum_d v_d * tanh(proj[b,s,d] + hb[b,d])  -> separable in d,
        # so chunk D to cap the live f32 intermediate at rows x d_chunk.
        for c in range(n_chunks):                             # static short loop
            lo, hi = c * d_chunk, (c + 1) * d_chunk
            proj = jnp.dot(enc, we_ref[:, lo:hi],
                           preferred_element_type=jnp.float32)      # MXU, f32 acc
            # free view: sublane split, S_pad is a multiple of 8
            energy = jnp.tanh(proj.reshape(bb, S_pad, d_chunk)
                              + hb_ref[:, lo:hi][:, None, :])       # f32 (v5e-safe)
            score = score + jnp.sum(energy * v_ref[:, lo:hi][:, None, :],
                                    axis=2)                          # (bb, S_pad)

        # mask padded src positions before the softmax
        if S_pad != S:
            lane = jax.lax.broadcasted_iota(jnp.int32, (bb, S_pad), 1)
            score = jnp.where(lane < S, score, jnp.float32(-1e30))

        # numerically stable softmax over src_len (lane axis), all f32
        m = jnp.max(score, axis=1, keepdims=True)
        e = jnp.exp(score - m)
        out_ref[...] = (e / jnp.sum(e, axis=1, keepdims=True)).astype(out_ref.dtype)

    return kernel


def attention_forward(hidden, encoder_outputs, attn_w, attn_b, v_w, *,
                      compute_dtype=jnp.bfloat16):
    """
    hidden:           (num_layers, batch, dec_hid)  float32 (or tuple -> [0])
    encoder_outputs:  (batch, src_len, enc_hid)     float32
    attn_w:           (dec_hid, enc_hid + dec_hid)  PyTorch Linear weight (out, in)
    attn_b:           (dec_hid,)
    v_w:              (1, dec_hid)
    compute_dtype:    dtype of the streamed encoder tensor / W_e fed to the MXU
                      (bf16 default; f32 accumulation + f32 tanh/softmax kept).
    returns:          (batch, src_len) softmax attention weights, float32
    """
    if isinstance(hidden, tuple):
        hidden = hidden[0]
    B, S, E = encoder_outputs.shape
    D = hidden.shape[-1]

    # cat([hidden, enc]) @ W^T == hidden @ W_h + enc @ W_e  (hidden comes first)
    w_h = attn_w[:, :D].T.astype(jnp.float32)               # (D, D)
    w_e = attn_w[:, D:].T.astype(compute_dtype)             # (E, D)

    # Hoist the degenerate hidden projection + bias out of the kernel (f32).
    hb = hidden[-1].astype(jnp.float32) @ w_h + attn_b.astype(jnp.float32)   # (B, D)
    v_row = v_w.reshape(1, D).astype(jnp.float32)

    # pad src_len to a sublane multiple: free view reshapes + clean DMA tiles
    S_pad = _round_up(S, 8)

    # D chunking: cap the f32 proj/energy intermediate at rows x d_chunk
    if D > 256 and D % 256 == 0:
        d_chunk = 256
    elif D > 128 and D % 128 == 0:
        d_chunk = 128
    else:
        d_chunk = D
    n_chunks = D // d_chunk

    enc_itemsize = jnp.dtype(compute_dtype).itemsize
    try:
        vmem_cap = int(pltpu.get_tpu_info().vmem_capacity_bytes)
    except Exception:
        vmem_cap = 0
    if vmem_cap <= 0:
        vmem_cap = 64 << 20                  # v7x per-TC VMEM (smallest generation)
    budget = min(int(0.5 * vmem_cap), 64 << 20)

    bb = _choose_bb(B, S_pad, E, D, d_chunk, enc_itemsize, enc_itemsize, budget)
    B_pad = _round_up(B, bb)
    grid = (B_pad // bb,)

    enc = encoder_outputs.astype(compute_dtype)
    if S_pad != S or B_pad != B:
        enc = jnp.pad(enc, ((0, B_pad - B), (0, S_pad - S), (0, 0)))
    enc2d = enc.reshape(B_pad * S_pad, E)                    # contiguous row stream
    if B_pad != B:
        hb = jnp.pad(hb, ((0, B_pad - B), (0, 0)))

    need = _vmem_need_bytes(bb, S_pad, E, D, d_chunk, enc_itemsize, enc_itemsize)
    vmem_limit = int(min(max(2 * need, 32 << 20), int(0.8 * vmem_cap)))

    kernel = _make_attention_kernel(bb, S_pad, S, d_chunk, n_chunks)

    out = pl.pallas_call(
        kernel,
        out_shape=jax.ShapeDtypeStruct((B_pad, S_pad), jnp.float32),
        grid=grid,
        in_specs=[
            pl.BlockSpec((bb, D), lambda b: (b, 0)),            # hb (f32)
            pl.BlockSpec((bb * S_pad, E), lambda b: (b, 0)),    # encoder rows (streamed)
            pl.BlockSpec((E, D), lambda b: (0, 0)),             # W_e
            pl.BlockSpec((1, D), lambda b: (0, 0)),             # v
        ],
        out_specs=pl.BlockSpec((bb, S_pad), lambda b: (b, 0)),  # lane-dense (S on lanes)
        compiler_params=pltpu.CompilerParams(
            dimension_semantics=("parallel",),
            vmem_limit_bytes=vmem_limit),
    )(hb, enc2d, w_e, v_row)

    return out[:B, :S]


def attention_reference(hidden, encoder_outputs, attn_w, attn_b, v_w):
    """Pure-JAX reference mirroring the PyTorch forward."""
    if isinstance(hidden, tuple):
        hidden = hidden[0]
    B, S, E = encoder_outputs.shape
    D = hidden.shape[-1]
    last_hidden = jnp.broadcast_to(hidden[-1][:, None, :], (B, S, D))
    cat = jnp.concatenate([last_hidden, encoder_outputs], axis=2)       # (B, S, D+E)
    energy = jnp.tanh(jnp.einsum("bsk,dk->bsd", cat, attn_w) + attn_b)  # (B, S, D)
    attention = jnp.einsum("bsd,od->bso", energy, v_w)[:, :, 0]         # (B, S)
    return jax.nn.softmax(attention, axis=1)


if __name__ == "__main__":
    # ---- test 1: module-sized shapes, f32 streaming; exercises S padding/masking
    num_layers, batch, src_len = 1, 2, 10
    enc_hid, dec_hid = 32, 32

    key = jax.random.PRNGKey(0)
    k_h, k_enc, k_w, k_b, k_v = jax.random.split(key, 5)

    hidden = jax.random.normal(k_h, (num_layers, batch, dec_hid), jnp.float32)
    encoder_outputs = jax.random.normal(k_enc, (batch, src_len, enc_hid), jnp.float32)
    attn_w = 0.1 * jax.random.normal(k_w, (dec_hid, enc_hid + dec_hid), jnp.float32)
    attn_b = 0.1 * jax.random.normal(k_b, (dec_hid,), jnp.float32)
    v_w = 0.1 * jax.random.normal(k_v, (1, dec_hid), jnp.float32)

    out = attention_forward(hidden, encoder_outputs, attn_w, attn_b, v_w,
                            compute_dtype=jnp.float32)
    out = jax.block_until_ready(out)
    ref = attention_reference(hidden, encoder_outputs, attn_w, attn_b, v_w)
    np.testing.assert_allclose(np.asarray(out), np.asarray(ref), atol=1e-5, rtol=1e-5)

    # ---- test 2: larger shapes, default bf16 streaming, multi-block grid, D tiling
    B2, S2, E2, D2 = 16, 256, 256, 512
    k2 = jax.random.PRNGKey(1)
    k_h2, k_enc2, k_w2, k_b2, k_v2 = jax.random.split(k2, 5)
    hidden2 = jax.random.normal(k_h2, (1, B2, D2), jnp.float32)
    enc2 = jax.random.normal(k_enc2, (B2, S2, E2), jnp.float32)
    attn_w2 = 0.05 * jax.random.normal(k_w2, (D2, E2 + D2), jnp.float32)
    attn_b2 = 0.05 * jax.random.normal(k_b2, (D2,), jnp.float32)
    v_w2 = 0.05 * jax.random.normal(k_v2, (1, D2), jnp.float32)

    out2 = jax.block_until_ready(
        attention_forward(hidden2, enc2, attn_w2, attn_b2, v_w2))   # bf16 default
    ref2 = attention_reference(hidden2, enc2, attn_w2, attn_b2, v_w2)
    np.testing.assert_allclose(np.asarray(out2), np.asarray(ref2), atol=2e-2, rtol=0)

    print("KERNEL_OK")
</pallas_src>

<mosaic_0001>
module attributes {stable_mosaic.version = 11 : i64} {
  func.func @kernel(%arg0: i32, %arg1: memref<2x32xf32, #tpu.memory_space<vmem>>, %arg2: memref<32x32xf32, #tpu.memory_space<vmem>>, %arg3: memref<32x32xf32, #tpu.memory_space<vmem>>, %arg4: memref<1x32xf32, #tpu.memory_space<vmem>>, %arg5: memref<2x16xf32, #tpu.memory_space<vmem>>) attributes {dimension_semantics = [#tpu.dimension_semantics<parallel>], iteration_bounds = array<i64: 1>, scalar_prefetch = 0 : i64, scratch_operands = 0 : i64, tpu.core_type = #tpu.core_type<tc>, window_params = [{transform_indices = @transform_0, window_bounds = array<i64: 2, 32>}, {transform_indices = @transform_1, window_bounds = array<i64: 32, 32>}, {pipeline_mode = #tpu.pipeline_mode<synchronous>, transform_indices = @transform_2, window_bounds = array<i64: 32, 32>}, {pipeline_mode = #tpu.pipeline_mode<synchronous>, transform_indices = @transform_3, window_bounds = array<i64: 1, 32>}, {transform_indices = @transform_4, window_bounds = array<i64: 2, 16>}]} {
    %c0 = arith.constant 0 : index
    %c0_0 = arith.constant 0 : index
    %0 = vector.load %arg2[%c0, %c0_0] : memref<32x32xf32, #tpu.memory_space<vmem>>, vector<32x32xf32>
    %cst = arith.constant 0.000000e+00 : f32
    %1 = vector.broadcast %cst : f32 to vector<2x16xf32>
    %c0_1 = arith.constant 0 : index
    %c0_2 = arith.constant 0 : index
    %2 = vector.load %arg3[%c0_1, %c0_2] : memref<32x32xf32, #tpu.memory_space<vmem>>, vector<32x32xf32>
    %cst_3 = arith.constant dense<0.000000e+00> : vector<32x32xf32>
    %3 = tpu.matmul %0, %2, %cst_3 {dimension_numbers = #tpu.dot_dimension_numbers<[1], [0], [0], [1], [0, 0, 1, 1], [], []>} : vector<32x32xf32>, vector<32x32xf32>, vector<32x32xf32> -> vector<32x32xf32>
    %4 = vector.shape_cast %3 : vector<32x32xf32> to vector<2x16x32xf32>
    %c0_4 = arith.constant 0 : index
    %c0_5 = arith.constant 0 : index
    %5 = vector.load %arg1[%c0_4, %c0_5] : memref<2x32xf32, #tpu.memory_space<vmem>>, vector<2x32xf32>
    %6 = vector.shape_cast %5 : vector<2x32xf32> to vector<2x1x32xf32>
    %7 = vector.broadcast %6 : vector<2x1x32xf32> to vector<2x16x32xf32>
    %8 = arith.addf %4, %7 : vector<2x16x32xf32>
    %9 = math.tanh %8 : vector<2x16x32xf32>
    %c0_6 = arith.constant 0 : index
    %c0_7 = arith.constant 0 : index
    %10 = vector.load %arg4[%c0_6, %c0_7] : memref<1x32xf32, #tpu.memory_space<vmem>>, vector<1x32xf32>
    %11 = vector.shape_cast %10 : vector<1x32xf32> to vector<1x1x32xf32>
    %12 = vector.broadcast %11 : vector<1x1x32xf32> to vector<2x16x32xf32>
    %13 = arith.mulf %9, %12 : vector<2x16x32xf32>
    %cst_8 = arith.constant dense<0.000000e+00> : vector<2x16xf32>
    %14 = vector.multi_reduction <add>, %13, %cst_8 [2] : vector<2x16x32xf32> to vector<2x16xf32>
    %15 = arith.addf %1, %14 : vector<2x16xf32>
    %16 = tpu.iota {dimensions = array<i32: 1>} : vector<2x16xi32>
    %c10_i32 = arith.constant 10 : i32
    %17 = vector.broadcast %c10_i32 : i32 to vector<2x16xi32>
    %18 = arith.cmpi slt, %16, %17 : vector<2x16xi32>
    %cst_9 = arith.constant -1.000000e+30 : f32
    %19 = vector.broadcast %cst_9 : f32 to vector<2x16xf32>
    %20 = arith.select %18, %15, %19 : vector<2x16xi1>, vector<2x16xf32>
    %cst_10 = arith.constant dense<0xFF800000> : vector<2xf32>
    %21 = vector.multi_reduction <maximumf>, %20, %cst_10 [1] : vector<2x16xf32> to vector<2xf32>
    %22 = vector.shape_cast %21 : vector<2xf32> to vector<2x1xf32>
    %23 = vector.broadcast %22 : vector<2x1xf32> to vector<2x16xf32>
    %24 = arith.subf %20, %23 : vector<2x16xf32>
    %25 = math.exp %24 : vector<2x16xf32>
    %cst_11 = arith.constant dense<0.000000e+00> : vector<2xf32>
    %26 = vector.multi_reduction <add>, %25, %cst_11 [1] : vector<2x16xf32> to vector<2xf32>
    %27 = vector.shape_cast %26 : vector<2xf32> to vector<2x1xf32>
    %28 = vector.broadcast %27 : vector<2x1xf32> to vector<2x16xf32>
    %29 = arith.divf %25, %28 : vector<2x16xf32>
    %c0_12 = arith.constant 0 : index
    %c0_13 = arith.constant 0 : index
    %30 = vector.load %arg5[%c0_12, %c0_13] : memref<2x16xf32, #tpu.memory_space<vmem>>, vector<2x16xf32>
    tpu.vector_store %arg5[%c0_12, %c0_13], %29 {strides = array<i32>} : memref<2x16xf32, #tpu.memory_space<vmem>>, vector<2x16xf32>,
    return
  }
  func.func @transform_0(%arg0: i32) -> (i32, i32) {
    %c0_i32 = arith.constant 0 : i32
    %c0_i32_0 = arith.constant 0 : i32
    return %arg0, %c0_i32 : i32, i32
  }
  func.func @transform_1(%arg0: i32) -> (i32, i32) {
    %c0_i32 = arith.constant 0 : i32
    %c0_i32_0 = arith.constant 0 : i32
    return %arg0, %c0_i32 : i32, i32
  }
  func.func @transform_2(%arg0: i32) -> (i32, i32) {
    %c0_i32 = arith.constant 0 : i32
    %c0_i32_0 = arith.constant 0 : i32
    %c0_i32_1 = arith.constant 0 : i32
    return %c0_i32, %c0_i32_0 : i32, i32
  }
  func.func @transform_3(%arg0: i32) -> (i32, i32) {
    %c0_i32 = arith.constant 0 : i32
    %c0_i32_0 = arith.constant 0 : i32
    %c0_i32_1 = arith.constant 0 : i32
    return %c0_i32, %c0_i32_0 : i32, i32
  }
  func.func @transform_4(%arg0: i32) -> (i32, i32) {
    %c0_i32 = arith.constant 0 : i32
    %c0_i32_0 = arith.constant 0 : i32
    return %arg0, %c0_i32 : i32, i32
  }
}

</mosaic_0001>

<bundles_post_ra>
// kernel: tpu_custom_call.1
= control target key start
LH: loop header
LB: loop body
LE: loop exit
PB: predicated region body
PF: predicated region fallthrough
CT: control target
= control target key end

     0   :  { %9 = vsyncpa [#allocation3], 0  ;;  %s545_s0 = inlined_call_operand.hbm [shape: f32[2,32], index: 0, kind: input, shape index: {}]   ;;  %s546_s1 = inlined_call_operand.hbm [shape: f32[32,32], index: 1, kind: input, shape index: {}]   ;;  %s547_s2 = inlined_call_operand.hbm [shape: f32[32,32], index: 2, kind: input, shape index: {}]   ;;  %s548_s3 = inlined_call_operand.vmem [shape: f32[1,32], index: 3, kind: input, shape index: {}]   ;;  %s549_s4 = inlined_call_operand.hbm [shape: f32[2,16], index: 4, kind: output, shape index: {}]  }
   0x1   :  { %10 = vsyncpa [#allocation6], 0 }
   0x2   :  { %11 = vsyncpa [#allocation4], 0  ;;  %s445_s15 = smov [#allocation5]   ;;  %s351_s19 = scalar_lea.hbm %s546_s1, 512 }
   0x3   :  { %s27_s16 = sshll.u32 %s445_s15, 4  ;;  %p352_p0 = scmp.ne.s32.totalorder %s546_s1, %s351_s19  ;;  %s28_s16 = int_to_ptr.vmem [resolvable:$true] %s27_s16 }
   0x4   :  { %p355_p1 = scmp.lt.u32.totalorder %s351_s19, %s546_s1 }
   0x6   :  { %p357_p2 = pnand %p355_p1, %p352_p0 }
   0x8   :  { %360 = shalt.err (!%p357_p2)
}
   0x9   :  { %s361_s24 = scalar_lea.vmem %s28_s16, 512  ;;  %p366_p4 = scmp.lt.s32.totalorder %s28_s16, %s28_s16 }
   0xa   :  { %p362_p3 = scmp.ne.s32.totalorder %s28_s16, %s361_s24  ;;  %p367_p5 = scmp.lt.s32.totalorder %s361_s24, %s361_s24 }
   0xc   :  { %p368_p6 = por %p367_p5, %p366_p4 }
   0xe   :  { %p369_p7 = pnand %p368_p6, %p362_p3 }
  0x10   :  { %372 = shalt.err (!%p369_p7)
}
  0x11   :  { %s446_s25 = smov 128   ;;  %s447_s26 = smov 8  }
  0x12   :  { %33 = dma.hbm_to_vmem [thread:$0]  %s546_s1, 512, %s28_s16, [#allocation6], %s446_s25, %s446_s25, %s447_s26  }
  0x13   :  { %s448_s29 = smov [#allocation2]   ;;  %s449_s5 = smov [#allocation7]  }
  0x14   :  { %s18_s30 = sshll.u32 %s448_s29, 4  ;;  %s39_s6 = sshll.u32 %s449_s5, 4  ;;  %s19_s30 = int_to_ptr.vmem [resolvable:$true] %s18_s30  ;;  %s40_s6 = int_to_ptr.vmem [resolvable:$true] %s39_s6 }
  0x15   :  { %s373_s9 = scalar_lea.hbm %s545_s0, 32 }
  0x16   :  { %p374_p8 = scmp.ne.s32.totalorder %s545_s0, %s373_s9  ;;  %p377_p9 = scmp.lt.u32.totalorder %s373_s9, %s545_s0 }
  0x18   :  { %p379_p10 = pnand %p377_p9, %p374_p8 }
  0x1a   :  { %382 = shalt.err (!%p379_p10)
}
  0x1b   :  { %s383_s1 = scalar_lea.vmem %s19_s30, 32  ;;  %p388_p12 = scmp.lt.s32.totalorder %s19_s30, %s19_s30 }
  0x1c   :  { %p384_p11 = scmp.ne.s32.totalorder %s19_s30, %s383_s1  ;;  %p389_p13 = scmp.lt.s32.totalorder %s383_s1, %s383_s1 }
  0x1e   :  { %p390_p0 = por %p389_p13, %p388_p12 }
  0x20   :  { %p391_p1 = pnand %p390_p0, %p384_p11 }
  0x22   :  { %394 = shalt.err (!%p391_p1)
}
  0x23   :  { %21 = dma.hbm_to_vmem [thread:$0]  %s545_s0, 32, %s19_s30, [#allocation3]  }
  0x24   :  { %s395_s18 = scalar_lea.hbm %s547_s2, 512 }
  0x25   :  { %p396_p2 = scmp.ne.s32.totalorder %s547_s2, %s395_s18  ;;  %p399_p3 = scmp.lt.u32.totalorder %s395_s18, %s547_s2 }
  0x27   :  { %p401_p4 = pnand %p399_p3, %p396_p2 }
  0x29   :  { %404 = shalt.err (!%p401_p4)
}
  0x2a   :  { %s405_s23 = scalar_lea.vmem %s40_s6, 512  ;;  %p410_p6 = scmp.lt.s32.totalorder %s40_s6, %s40_s6 }
  0x2b   :  { %p406_p5 = scmp.ne.s32.totalorder %s40_s6, %s405_s23  ;;  %p411_p7 = scmp.lt.s32.totalorder %s405_s23, %s405_s23 }
  0x2d   :  { %p412_p8 = por %p411_p7, %p410_p6 }
  0x2f   :  { %p413_p9 = pnand %p412_p8, %p406_p5 }
  0x31   :  { %416 = shalt.err (!%p413_p9)
}
  0x32   :  { %45 = dma.hbm_to_vmem [thread:$0]  %s547_s2, 512, %s40_s6, [#allocation6], %s446_s25, %s446_s25, %s447_s26  }
  0x33   :  { %439 = dma.done.wait [#allocation3], 32  }
  0x34   :  { %440 = vsyncadd [#allocation3], 4294967264 }
  0x35   :  { %441 = dma.done.wait [#allocation6], 1024  }
  0x36   :  { %442 = vsyncadd [#allocation6], 4294966272  ;;  %vm65_vm0 = vcmask 261120   ;;  %v61_v0 = vld [vmem:[#allocation7] sm:$0xff]  ;;  %v62_v1 = vld [vmem:[#allocation7 + $0x8] sm:$0xff]  ;;  %v176_v12 = vlaneseq  ;;  %vm248_vm1 = vcmask 130112  }
  0x37   :  { %v63_v2 = vld [vmem:[#allocation7 + $0x10] sm:$0xff]  ;;  %v320_v3 = vpack.c.bf16 %v62_v1, %v61_v0  ;;  %v64_v4 = vld [vmem:[#allocation7 + $0x18] sm:$0xff]  ;;  %v57_v5 = vld [vmem:[#allocation5] sm:$0xff]  ;;  %v450_v10 = vmov 1966171168   ;;  %vm259_vm2 = vcmask 1041409  }
  0x38   :  { %v59_v6 = vld [vmem:[#allocation5 + $0x10] sm:$0xff]  ;;  %v324_v7 = vpack.c.bf16 %v64_v4, %v63_v2  ;;  %314 = vmatprep.mubr.msk.f32.mxu0 %vm65_vm0, %v57_v5  ;;  %v58_v8 = vld [vmem:[#allocation5 + $0x8] sm:$0xff]  ;;  %v60_v9 = vld [vmem:[#allocation5 + $0x18] sm:$0xff]  ;;  %v174_v11 = vunpack.c.l.s4 %v450_v10  ;;  %v177_v14 = vshrl.u32 %v176_v12, 7  ;;  %v233_v44 = vand.u32 127, %v176_v12 }
  0x39   :  { %317 = vmatprep.mubr.msk.f32.mxu1 %vm65_vm0, %v59_v6  ;;  %321 = vmatprep.subr.bf16.mxu0 %v320_v3  ;;  %v296_v15 = vld.sshfl [vmem:[#allocation2] sm:$0x11 pattern:$0x75316420]  ;;  %vm263_vm4 = vcmask 123904  }
  0x3a   :  { %328 = vmatprep.subr.bf16.mxu1 %v320_v3  ;;  %323 = vmatpush3.bf16.msra.mxu0 %v320_v3  ;;  %v175_v13 = vunpack.c.0.s8 %v174_v11  ;;  %v172_v17 = vcombine.high %v296_v15, %v296_v15  ;;  %v189_v19 = vsub.s32 0, %v177_v14  ;;  %v297_v32 = vld [vmem:[%s548_s3] ss:$0 sm:$0xff]  ;;  %v243_v45 = vadd.s32 4294967288, %v233_v44  ;;  %s451_s3 = smov [#allocation8]  }
  0x3b   :  { %330 = vmatpush3.bf16.msra.mxu1 %v320_v3  ;;  %325 = vmatprep.subr.bf16.mxu0 %v324_v7  ;;  %v241_v47 = vsub.s32 %v233_v44, %v177_v14  ;;  %vm234_vm3 = vcmp.lt.s32.totalorder %v233_v44, 10  ;;  %s282_s26 = sshll.u32 %s451_s3, 4  ;;  %s283_s26 = int_to_ptr.vmem [resolvable:$true] %s282_s26 }
  0x3c   :  { %329 = vmatprep.subr.bf16.mxu1 %v324_v7  ;;  %v178_v16 = vsub.s32 %v175_v13, %v177_v14  ;;  %v246_v49 = vsub.s32 %v243_v45, %v177_v14  ;;  %s417_s27 = scalar_lea.vmem %s283_s26, 32  ;;  %p422_p11 = scmp.lt.s32.totalorder %s283_s26, %s283_s26 }
  0x3d   :  { %p418_p10 = scmp.ne.s32.totalorder %s283_s26, %s417_s27  ;;  %p423_p12 = scmp.lt.s32.totalorder %s417_s27, %s417_s27 }
  0x3e   :  { %327 = vmatpush3.bf16.msra.mxu0 %v324_v7  ;;  %v179_v18 = vrot.slane %v296_v15, %v178_v16  ;;  %v186_v20 = vrot.slane %v172_v17, %v178_v16 }
  0x3f   :  { %331 = vmatpush3.bf16.msra.mxu1 %v324_v7  ;;  %p424_p13 = por %p423_p12, %p422_p11 }
  0x40   :  { %v190_v21 = vrot.slane %v179_v18, %v189_v19  ;;  %v194_v22 = vrot.slane %v186_v20, %v189_v19 }
  0x41   :  { %315 = vmatmul.mubr.msk.f32.vlgmr.msra.gmra.mrb[0].mxu0 %vm65_vm0, %v58_v8  ;;  %p425_p0 = pnand %p424_p13, %p418_p10 }
  0x42   :  { %318 = vmatmul.mubr.msk.f32.vlgmr.msra.gmra.mrb[0].mxu1 %vm65_vm0, %v60_v9 }
 0x114   :  { %v316_v23 = vpop.f32.mrb[0].mxu0 }
 0x115   :  { %v319_v24 = vpop.f32.mrb[0].mxu1  ;;  %v198_v25 = vadd.f32 %v316_v23, %v190_v21  ;;  %v144_v27 = vpop.f32.mrb[1].mxu0 }
 0x116   :  { %v200_v26 = vadd.f32 %v319_v24, %v194_v22  ;;  %v154_v28 = vpop.f32.mrb[1].mxu1  ;;  %v197_v29 = vadd.f32 %v190_v21, %v144_v27 }
 0x117   :  { %v199_v30 = vadd.f32 %v194_v22, %v154_v28  ;;  %339 = vtanh.f32 %v198_v25 }
 0x118   :  { %341 = vtanh.f32 %v200_v26 }
 0x119   :  { %343 = vtanh.f32 %v197_v29 }
 0x11a   :  { %345 = vtanh.f32 %v199_v30 }
 0x121   :  { %v340_v31 = vpop.eup %339 }
 0x122   :  { %v342_v33 = vpop.eup %341  ;;  %v213_v39 = vmul.f32 %v340_v31, %v297_v32 }
 0x123   :  { %v344_v34 = vpop.eup %343  ;;  %v215_v41 = vmul.f32 %v342_v33, %v297_v32 }
 0x124   :  { %v346_v35 = vpop.eup %345  ;;  %v212_v36 = vmul.f32 %v344_v34, %v297_v32  ;;  %v219_v42 = vsel %vm65_vm0, %v213_v39, 0.0 }
 0x125   :  { %v214_v37 = vmul.f32 %v346_v35, %v297_v32  ;;  %v225_v43 = vsel %vm65_vm0, %v215_v41, 0.0 }
 0x126   :  { %v216_v38 = vsel %vm65_vm0, %v212_v36, 0.0 }
 0x127   :  { %v222_v40 = vsel %vm65_vm0, %v214_v37, 0.0  ;;  %217 = vadd.xlane.f32.xlu0 %v216_v38 }
 0x128   :  { %223 = vadd.xlane.f32.xlu1 %v222_v40 }
 0x12b   :  { %220 = vadd.xlane.f32.xlu0 %v219_v42 }
 0x12c   :  { %226 = vadd.xlane.f32.xlu1 %v225_v43 }
 0x1b4   :  { %v218_v46 = vpop.xlane.xlu0 %217 }
 0x1b5   :  { %v224_v48 = vpop.xlane.xlu1 %223  ;;  %v242_v51 = vrot.slane %v218_v46, %v241_v47 }
 0x1b6   :  { %v253_v54 = vrot.slane %v224_v48, %v241_v47 }
 0x1b8   :  { %v221_v50 = vpop.xlane.xlu0 %220 }
 0x1b9   :  { %v227_v52 = vpop.xlane.xlu1 %226  ;;  %v247_v53 = vrot.slane %v221_v50, %v246_v49 }
 0x1ba   :  { %v257_v55 = vrot.slane %v227_v52, %v246_v49 }
 0x1bb   :  { %v249_v56 = vsel %vm248_vm1, %v247_v53, %v242_v51 }
 0x1bc   :  { %v258_v57 = vsel %vm248_vm1, %v257_v55, %v253_v54 }
 0x1bd   :  { %v260_v58 = vsel %vm259_vm2, %v258_v57, %v249_v56 }
 0x1be   :  { %v262_v59 = vsel %vm234_vm3, %v260_v58, -1e+30 }
 0x1bf   :  { %v264_v60 = vsel %vm263_vm4, %v262_v59, -inf }
 0x1c0   :  { %265 = vmax.xlane.f32.xlu0 %v264_v60 }
 0x24d   :  { %v266_v61 = vpop.xlane.xlu0 %265 }
 0x24e   :  { %v267_v62 = vsub.f32 %v262_v59, %v266_v61 }
 0x250   :  { %v268_v63 = vmul.f32 1.442695, %v267_v62 }
 0x252   :  { %347 = vpow2.f32 %v268_v63 }
 0x25c   :  { %v348_v0 = vpop.eup %347 }
 0x25d   :  { %v270_v1 = vsel %vm263_vm4, %v348_v0, 0.0 }
 0x25e   :  { %271 = vadd.xlane.f32.xlu1 %v270_v1 }
 0x2eb   :  { %v272_v2 = vpop.xlane.xlu1 %271 }
 0x2ec   :  { %349 = vrcp.f32 %v272_v2 }
 0x2f6   :  { %v350_v3 = vpop.eup %349 }
 0x2f7   :  { %v274_v4 = vmul.f32 %v350_v3, %v348_v0 }
 0x2f9   :  { %275 = vst.msk [vmem:[#allocation8] sm:$0x3] %vm263_vm4, %v274_v4 }
 0x2fa   :  { %428 = shalt.err (!%p425_p0)
}
 0x2fb   :  { %s429_s30 = scalar_lea.hbm %s549_s4, 32 }
 0x2fc   :  { %p430_p1 = scmp.ne.s32.totalorder %s549_s4, %s429_s30  ;;  %p433_p2 = scmp.lt.u32.totalorder %s429_s30, %s549_s4 }
 0x2fe   :  { %p435_p3 = pnand %p433_p2, %p430_p1 }
 0x300   :  { %438 = shalt.err (!%p435_p3)
}
 0x301   :  { %285 = dma.vmem_to_hbm [thread:$0]  %s283_s26, 32, %s549_s4, [#allocation4]  }
 0x302   :  { %443 = dma.done.wait [#allocation4], 32  }
 0x303   :  { %444 = vsyncadd [#allocation4], 4294967264 }
 0x304   :  { %289 = vsyncpa [#allocation3], 1 }
 0x305   :  { %290 = vsyncpa [#allocation6], 1 }
 0x306   :  { %291 = vsyncpa [#allocation4], 1 }

</bundles_post_ra>
